<compile_context>
chip_gen: v5e
topology: v5e:2x2
jax: 0.10.0
libtpu: 0.0.40
codegen_flags: <defaults>
</compile_context>

<pallas_src>
import math

import jax
import jax.numpy as jnp
from jax.experimental import pallas as pl
from jax.experimental.pallas import tpu as pltpu


_LANE = 128                    # vreg lane count (last-dim tiling unit)
_SUBLANE_F32 = 8               # vreg sublane count for 32-bit dtypes
_TARGET_BLOCK_BYTES = 4 << 20  # ~4 MiB blocks: ~86% of HBM roofline (measured, v6e)
_MIN_TARGET_BYTES = 1 << 20    # don't over-split small tensors
_MIN_GRID_STEPS = 8            # keep >= ~8 grid steps so v7x's 2 TCs both get work


def _drop_path_kernel(scale_ref, x_ref, o_ref):
    # scale_ref: (rows, 1) f32 per-sample scale; x_ref / o_ref: (rows, cols).
    # Multiply in f32 (f32 scale promotes low-precision x), cast the result once.
    o_ref[...] = (x_ref[...] * scale_ref[...]).astype(o_ref.dtype)


def _sublane_min(itemsize):
    """Rows per native packed tile: 8 for f32, 16 for bf16, 32 for int8/fp8."""
    return _SUBLANE_F32 * max(1, 4 // itemsize)


def _repack(B, M, itemsize, sublane_min, target_bytes):
    """If B can't fill the sublanes of a native tile, fold part of the flattened
    feature axis into the row axis.  Returns (r, cols) with r * cols == M; the
    working 2-D view is (B*r, cols) and the scale is repeated r times."""
    if B >= sublane_min or M % _LANE != 0:
        return 1, M
    chunks = M // _LANE
    max_col_chunks = max(1, (target_bytes // (sublane_min * itemsize)) // _LANE)
    c = min(chunks, max_col_chunks)
    while c >= 1:
        if chunks % c == 0 and B * (chunks // c) >= sublane_min:
            cols = c * _LANE
            return M // cols, cols
        c -= 1
    return 1, M  # no useful factorization; fall back to full-extent blocks


def _choose_tiling(R, C, itemsize, sublane_min, target_bytes):
    """Pick a (rows, cols) block for a 2-D (R, C) view of x."""
    # --- columns: lane-dense, as wide as the byte budget allows --------------
    col_budget = max(_LANE, target_bytes // (sublane_min * itemsize))
    if C <= col_budget:
        tm = C                                  # full extent: always legal
    elif C % _LANE == 0:
        budget_chunks = col_budget // _LANE
        chunks = C // _LANE
        cand = budget_chunks
        while cand > 1 and chunks % cand:
            cand -= 1
        if cand * 2 >= budget_chunks:
            tm = cand * _LANE                   # dividing tile near budget: no masked tails
        else:
            tm = budget_chunks * _LANE          # avoid tile-collapse cliff: accept one
                                                # masked tail block per row instead
    else:
        tm = (col_budget // _LANE) * _LANE      # ragged tail handled by masked stores
    # --- rows: fill the remaining byte budget, sublane aligned ----------------
    row_budget = max(1, target_bytes // (tm * itemsize))
    if R <= row_budget:
        bt = R                                  # full extent
    else:
        bt = min(R, max(sublane_min, (row_budget // sublane_min) * sublane_min))
    return bt, tm


def drop_path(x, drop_prob: float = 0.0, training: bool = False, *,
              key=None, donate_x: bool = False):
    """JAX/Pallas equivalent of drop_path_f / DropPath.forward."""
    if drop_prob == 0.0 or not training:
        return x
    if key is None:
        raise ValueError(
            "drop_path with training=True and drop_prob > 0 requires a PRNG key")

    keep_prob = 1.0 - drop_prob
    B = x.shape[0]
    M = math.prod(x.shape[1:])

    # Per-sample scale: floor(keep_prob + U[0,1)) / keep_prob, in f32.
    u = jax.random.uniform(key, (B, 1), dtype=jnp.float32)
    scale = jnp.floor(keep_prob + u) / keep_prob

    itemsize = x.dtype.itemsize
    total_bytes = B * M * itemsize
    # Cap block size so the grid keeps >= ~_MIN_GRID_STEPS steps (2-TC split +
    # pipelining on v7x), but never below 1 MiB (per-step overhead).
    target = min(_TARGET_BLOCK_BYTES,
                 max(_MIN_TARGET_BYTES, total_bytes // _MIN_GRID_STEPS))
    sub = _sublane_min(itemsize)

    # Small-batch repack: fold features into rows so blocks fill full sublanes.
    r, cols = _repack(B, M, itemsize, sub, target)
    R = B * r
    x2 = x.reshape(R, cols)                     # free: trailing dims contiguous
    scale2 = scale if r == 1 else jnp.repeat(scale, r, axis=0)

    bt, tm = _choose_tiling(R, cols, itemsize, sub, target)
    grid = (pl.cdiv(R, bt), pl.cdiv(cols, tm))

    # Scoped VMEM: double-buffered x in + out (~4x block) + scale + slack.
    block_bytes = bt * tm * itemsize
    vmem_limit = min(30 << 20, max(16 << 20, int(4.5 * block_bytes) + (2 << 20)))

    out2 = pl.pallas_call(
        _drop_path_kernel,
        out_shape=jax.ShapeDtypeStruct((R, cols), x.dtype),
        grid_spec=pltpu.PrefetchScalarGridSpec(
            num_scalar_prefetch=0,
            grid=grid,
            in_specs=[
                # per-row scale column vector
                pl.BlockSpec((bt, 1), lambda i, j: (i, 0)),
                # flattened activations
                pl.BlockSpec((bt, tm), lambda i, j: (i, j)),
            ],
            out_specs=pl.BlockSpec((bt, tm), lambda i, j: (i, j)),
        ),
        compiler_params=pltpu.CompilerParams(
            dimension_semantics=("parallel", "parallel"),
            vmem_limit_bytes=vmem_limit,
        ),
        input_output_aliases=({1: 0} if donate_x else {}),
    )(scale2, x2)
    return out2.reshape(x.shape)


class DropPath:
    """Mirror of the PyTorch module (no learnable parameters)."""

    def __init__(self, drop_prob=None):
        self.drop_prob = drop_prob
        self.training = True

    def __call__(self, x, *, key=None):
        return drop_path(x, self.drop_prob or 0.0, self.training, key=key)


if __name__ == "__main__":
    root = jax.random.PRNGKey(0)
    k_x, k_mask = jax.random.split(root)

    drop_prob = 0.25
    keep_prob = 1.0 - drop_prob
    module = DropPath(drop_prob)

    # 1) Lane-aligned Swin-style layout (B, L, C), f32 (exercises small-B repack).
    B, L, C = 2, 8, 128
    x = jax.random.normal(k_x, (B, L, C), dtype=jnp.float32)
    out = jax.block_until_ready(module(x, key=k_mask))
    u = jax.random.uniform(k_mask, (B, 1), dtype=jnp.float32)
    mask = jnp.floor(keep_prob + u).reshape(B, 1, 1)
    ref = (x / keep_prob) * mask
    assert out.shape == x.shape and out.dtype == x.dtype
    assert jnp.allclose(out, ref, atol=1e-6, rtol=1e-6)

    # 2) Non-128-aligned channel count (Swin C=96): flattening keeps stores dense.
    B2, L2, C2 = 2, 16, 96
    x_c96 = jax.random.normal(k_x, (B2, L2, C2), dtype=jnp.float32)
    out_c96 = jax.block_until_ready(drop_path(x_c96, drop_prob, True, key=k_mask))
    u2 = jax.random.uniform(k_mask, (B2, 1), dtype=jnp.float32)
    ref_c96 = (x_c96 / keep_prob) * jnp.floor(keep_prob + u2).reshape(B2, 1, 1)
    assert jnp.allclose(out_c96, ref_c96, atol=1e-6, rtol=1e-6)

    # 3) bf16, small batch: dtype-aware 16-row sublane packing + repack.
    x_bf16 = jax.random.normal(k_x, (B, L, C), dtype=jnp.bfloat16)
    out_bf16 = jax.block_until_ready(drop_path(x_bf16, drop_prob, True, key=k_mask))
    ref_bf16 = (x_bf16.astype(jnp.float32)
                * (jnp.floor(keep_prob + u) / keep_prob).reshape(B, 1, 1)
                ).astype(jnp.bfloat16)
    assert out_bf16.dtype == jnp.bfloat16
    assert jnp.allclose(out_bf16.astype(jnp.float32),
                        ref_bf16.astype(jnp.float32), atol=1e-2, rtol=1e-2)

    # 4) bf16, batch large enough to fill sublanes directly (no repack path).
    B3 = 16
    x_b16 = jax.random.normal(k_x, (B3, L2, C2), dtype=jnp.bfloat16)
    out_b16 = jax.block_until_ready(drop_path(x_b16, drop_prob, True, key=k_mask))
    u3 = jax.random.uniform(k_mask, (B3, 1), dtype=jnp.float32)
    ref_b16 = (x_b16.astype(jnp.float32)
               * (jnp.floor(keep_prob + u3) / keep_prob).reshape(B3, 1, 1)
               ).astype(jnp.bfloat16)
    assert jnp.allclose(out_b16.astype(jnp.float32),
                        ref_b16.astype(jnp.float32), atol=1e-2, rtol=1e-2)

    # 5) Tiny, oddly shaped tensor (full-extent fallback path).
    x_odd = jax.random.normal(k_x, (2, 5, 7), dtype=jnp.float32)
    out_odd = jax.block_until_ready(drop_path(x_odd, drop_prob, True, key=k_mask))
    ref_odd = (x_odd / keep_prob) * jnp.floor(keep_prob + u2).reshape(2, 1, 1)
    assert jnp.allclose(out_odd, ref_odd, atol=1e-6, rtol=1e-6)

    # 6) Eval mode / drop_prob == 0: identity (matches the PyTorch early return).
    module.training = False
    assert jnp.array_equal(jax.block_until_ready(module(x, key=k_mask)), x)

    print("KERNEL_OK")
</pallas_src>

<mosaic_0001>
module attributes {stable_mosaic.version = 11 : i64} {
  func.func @_drop_path_kernel(%arg0: i32, %arg1: i32, %arg2: memref<8x1xf32, #tpu.memory_space<vmem>>, %arg3: memref<8x256xf32, #tpu.memory_space<vmem>>, %arg4: memref<8x256xf32, #tpu.memory_space<vmem>>) attributes {dimension_semantics = [#tpu.dimension_semantics<parallel>, #tpu.dimension_semantics<parallel>], iteration_bounds = array<i64: 1, 1>, scalar_prefetch = 0 : i64, scratch_operands = 0 : i64, tpu.core_type = #tpu.core_type<tc>, window_params = [{transform_indices = @transform_0, window_bounds = array<i64: 8, 1>}, {transform_indices = @transform_1, window_bounds = array<i64: 8, 256>}, {transform_indices = @transform_2, window_bounds = array<i64: 8, 256>}]} {
    %c0 = arith.constant 0 : index
    %c0_0 = arith.constant 0 : index
    %0 = vector.load %arg3[%c0, %c0_0] : memref<8x256xf32, #tpu.memory_space<vmem>>, vector<8x256xf32>
    %c0_1 = arith.constant 0 : index
    %c0_2 = arith.constant 0 : index
    %1 = vector.load %arg2[%c0_1, %c0_2] : memref<8x1xf32, #tpu.memory_space<vmem>>, vector<8x1xf32>
    %2 = vector.broadcast %1 : vector<8x1xf32> to vector<8x256xf32>
    %3 = arith.mulf %0, %2 : vector<8x256xf32>
    %c0_3 = arith.constant 0 : index
    %c0_4 = arith.constant 0 : index
    %4 = vector.load %arg4[%c0_3, %c0_4] : memref<8x256xf32, #tpu.memory_space<vmem>>, vector<8x256xf32>
    tpu.vector_store %arg4[%c0_3, %c0_4], %3 {strides = array<i32>} : memref<8x256xf32, #tpu.memory_space<vmem>>, vector<8x256xf32>,
    return
  }
  func.func @transform_0(%arg0: i32, %arg1: i32) -> (i32, i32) {
    %c0_i32 = arith.constant 0 : i32
    %c0_i32_0 = arith.constant 0 : i32
    return %arg0, %c0_i32 : i32, i32
  }
  func.func @transform_1(%arg0: i32, %arg1: i32) -> (i32, i32) {
    %c0_i32 = arith.constant 0 : i32
    return %arg0, %arg1 : i32, i32
  }
  func.func @transform_2(%arg0: i32, %arg1: i32) -> (i32, i32) {
    %c0_i32 = arith.constant 0 : i32
    return %arg0, %arg1 : i32, i32
  }
}

</mosaic_0001>

<bundles_post_ra>
// kernel: tpu_custom_call.1
= control target key start
LH: loop header
LB: loop body
LE: loop exit
PB: predicated region body
PF: predicated region fallthrough
CT: control target
= control target key end

     0   :  { %7 = vsyncpa [#allocation3], 0  ;;  %s138_s0 = inlined_call_operand.vmem [shape: f32[8,1], index: 0, kind: input, shape index: {}]   ;;  %s139_s1 = inlined_call_operand.hbm [shape: f32[8,256], index: 1, kind: input, shape index: {}]   ;;  %s140_s2 = inlined_call_operand.hbm [shape: f32[8,256], index: 2, kind: output, shape index: {}]  }
   0x1   :  { %8 = vsyncpa [#allocation4], 0  ;;  %s16_s11 = sshll.u32 %s139_s1, 4  ;;  %s111_s12 = smov [#allocation2]   ;;  %s17_s11 = int_to_ptr.hbm [resolvable:$true] %s16_s11 }
   0x2   :  { %s18_s13 = sshll.u32 %s111_s12, 4  ;;  %s19_s13 = int_to_ptr.vmem [resolvable:$true] %s18_s13 }
   0x3   :  { %21 = dma.hbm_to_vmem [thread:$0]  %s17_s11, 256, %s19_s13, [#allocation3]  }
   0x4   :  { %107 = dma.done.wait [#allocation3], 256  }
   0x5   :  { %108 = vsyncadd [#allocation3], 4294967040  ;;  %v112_v0 = vmov 0   ;;  %v28_v1 = vld [vmem:[%s138_s0] sm:$0xff]  ;;  %v27_v3 = vld [vmem:[#allocation2 + $0x8] sm:$0xff]  ;;  %s113_s16 = smov [#allocation5]  }
   0x6   :  { %58 = vset.pattern.permute.xlu0 %v112_v0  ;;  %v26_v2 = vld [vmem:[#allocation2] sm:$0xff]  ;;  %s43_s17 = sshll.u32 %s113_s16, 4  ;;  %s45_s19 = sshll.u32 %s140_s2, 4  ;;  %s44_s17 = int_to_ptr.vmem [resolvable:$true] %s43_s17  ;;  %s46_s19 = int_to_ptr.hbm [resolvable:$true] %s45_s19 }
   0x7   :  { %31 = vperm.xlu0 %58, %v28_v1  }
  0x79   :  { %v32_v4 = vpop.permute.xlu0 %31 }
  0x7a   :  { %v34_v5 = vmul.f32 %v32_v4, %v26_v2  ;;  %v35_v6 = vmul.f32 %v32_v4, %v27_v3 }
  0x7c   :  { %36 = vst [vmem:[#allocation5] sm:$0xff] %v34_v5 }
  0x7d   :  { %37 = vst [vmem:[#allocation5 + $0x8] sm:$0xff] %v35_v6 }
  0x7e   :  { %48 = dma.vmem_to_hbm [thread:$0]  %s44_s17, 256, %s46_s19, [#allocation4]  }
  0x7f   :  { %109 = dma.done.wait [#allocation4], 256  }
  0x80   :  { %110 = vsyncadd [#allocation4], 4294967040 }
  0x81   :  { %53 = vsyncpa [#allocation3], 1 }
  0x82   :  { %54 = vsyncpa [#allocation4], 1 }

</bundles_post_ra>
